<compile_context>
chip_gen: v5e
topology: v5e:2x2
jax: 0.10.0
libtpu: 0.0.40
codegen_flags: <defaults>
</compile_context>

<pallas_src>
import functools

import numpy as np
import jax
import jax.numpy as jnp
from jax.experimental import pallas as pl
from jax.experimental.pallas import tpu as pltpu

_VMEM_LIMIT = 32 * 1024 * 1024   # safe on v5e/v6e/v7x; tiles below stay well under it


def _pick_tile(total, cap):
    """Largest tile <= cap that divides `total` and is a multiple of 16 (sublane
    tiling incl. bf16); fall back to the full dimension (always legal)."""
    if total <= cap:
        return total
    best = None
    for t in range(16, cap + 1, 16):
        if total % t == 0:
            best = t
    return best if best is not None else total


# ---------------------------------------------------------------------------
# 3-NN inverse-distance interpolation (shared in-kernel helper)
# ---------------------------------------------------------------------------
def _three_nn_interp(xyz1, xyz2_cs, pts2, s_bits):
    """xyz1 [TN,C], xyz2_cs [C,S], pts2 [S,D2] -> interpolated features [TN,D2] f32."""
    xyz1 = xyz1.astype(jnp.float32)
    xyz2_cs = xyz2_cs.astype(jnp.float32)
    TN, C = xyz1.shape
    S = xyz2_cs.shape[1]

    # Squared distances via unrolled VPU terms (no MXU K=3 matmul; d >= 0 by construction).
    d = jnp.zeros((TN, S), jnp.float32)
    for c in range(C):
        diff = xyz1[:, c:c + 1] - xyz2_cs[c:c + 1, :]
        d = d + diff * diff

    # 3-NN selection with a single cross-lane min per iteration: pack the column
    # index into the low mantissa bits of the (non-negative) distance so the value
    # and the argmin come out of one reduction. +1e-12 keeps keys in the normal-f32
    # range; ties resolve to the lowest index (matches "first index wins").
    mask = (1 << s_bits) - 1
    iota = jax.lax.broadcasted_iota(jnp.int32, (TN, S), 1)
    dbits = pltpu.bitcast(d + 1e-12, jnp.int32)
    key = pltpu.bitcast((dbits & jnp.int32(~mask)) | iota, jnp.float32)

    wsel = jnp.zeros((TN, S), jnp.float32)
    norm = jnp.zeros((TN, 1), jnp.float32)
    for _ in range(3):                                     # three nearest neighbours
        kmin = jnp.min(key, axis=-1, keepdims=True)        # single XLU reduction
        kbits = pltpu.bitcast(kmin, jnp.int32)
        imin = kbits & jnp.int32(mask)
        mval = pltpu.bitcast(kbits & jnp.int32(~mask), jnp.float32)
        onehot = iota == imin
        r = 1.0 / (mval + 1e-8)                            # dist_recip
        wsel = wsel + jnp.where(onehot, r, 0.0)            # scatter recip at NN column
        norm = norm + r
        key = jnp.where(onehot, jnp.float32(jnp.inf), key)
    w = wsel * pl.reciprocal(norm, approx=True)            # normalized weights [TN,S]

    # Weighted gather expressed as a sparse [TN,S] @ [S,D2] MXU matmul (bf16, f32 acc).
    return jnp.dot(w.astype(jnp.bfloat16), pts2.astype(jnp.bfloat16),
                   preferred_element_type=jnp.float32)


# ---------------------------------------------------------------------------
# Kernels
# ---------------------------------------------------------------------------
def _interp_kernel(xyz1_ref, xyz2_ref, pts2_ref, out_ref, *, s_bits):
    """Standalone interpolation (fallback path, points1 is None)."""
    out_ref[0] = _three_nn_interp(xyz1_ref[0], xyz2_ref[0], pts2_ref[0],
                                  s_bits).astype(out_ref.dtype)


def _fused_layer1_kernel(xyz1_ref, xyz2_ref, pts2_ref, p1_ref, w1_ref, w2_ref, b_ref,
                         y_ref, ssum_ref, ssq_ref, *, s_bits):
    """3-NN interpolation fused with the first 1x1 conv (weight split W1/W2) and the
    BatchNorm sum / sum-of-squares accumulation."""
    interp = _three_nn_interp(xyz1_ref[0], xyz2_ref[0], pts2_ref[0], s_bits)  # [TN,D2]
    y = (jnp.dot(p1_ref[0].astype(jnp.bfloat16), w1_ref[...],
                 preferred_element_type=jnp.float32)
         + jnp.dot(interp.astype(jnp.bfloat16), w2_ref[...],
                   preferred_element_type=jnp.float32)
         + b_ref[...])
    y_ref[0] = y

    @pl.when((pl.program_id(0) == 0) & (pl.program_id(1) == 0))
    def _():
        ssum_ref[...] = jnp.zeros_like(ssum_ref)
        ssq_ref[...] = jnp.zeros_like(ssq_ref)

    ssum_ref[...] = ssum_ref[...] + jnp.sum(y, axis=0, keepdims=True)
    ssq_ref[...] = ssq_ref[...] + jnp.sum(y * y, axis=0, keepdims=True)


def _layer_stats_kernel(x_ref, w_ref, b_ref, y_ref, ssum_ref, ssq_ref):
    """Generic MLP layer, pass 1: y = x @ W + b per M-tile + BN stat accumulation."""
    x = x_ref[...].astype(jnp.bfloat16)                    # MXU operand in bf16
    y = jnp.dot(x, w_ref[...], preferred_element_type=jnp.float32) + b_ref[...]
    y_ref[...] = y

    @pl.when(pl.program_id(0) == 0)
    def _():
        ssum_ref[...] = jnp.zeros_like(ssum_ref)
        ssq_ref[...] = jnp.zeros_like(ssq_ref)

    ssum_ref[...] = ssum_ref[...] + jnp.sum(y, axis=0, keepdims=True)
    ssq_ref[...] = ssq_ref[...] + jnp.sum(y * y, axis=0, keepdims=True)


def _bn_relu_kernel(y_ref, ssum_ref, ssq_ref, g_ref, beta_ref, o_ref, *, count):
    """Pass 2: normalize with global batch stats (biased var, eps=1e-5) + ReLU."""
    y = y_ref[...]
    inv_n = 1.0 / count
    mean = ssum_ref[...] * inv_n
    var = jnp.maximum(ssq_ref[...] * inv_n - mean * mean, 0.0)
    scale = g_ref[...] * jax.lax.rsqrt(var + 1e-5)
    o_ref[...] = jnp.maximum((y - mean) * scale + beta_ref[...], 0.0).astype(o_ref.dtype)


# ---------------------------------------------------------------------------
# pallas_call wrappers
# ---------------------------------------------------------------------------
def interpolate_points(xyz1t, xyz2_cs, p2t):
    """xyz1t [B,N,C], xyz2_cs [B,C,S] (native layout), p2t [B,S,D2] -> [B,N,D2]."""
    B, N, C = xyz1t.shape
    S = xyz2_cs.shape[2]
    D2 = p2t.shape[2]
    TN = _pick_tile(N, 256)
    s_bits = max(1, (S - 1).bit_length())
    return pl.pallas_call(
        functools.partial(_interp_kernel, s_bits=s_bits),
        out_shape=jax.ShapeDtypeStruct((B, N, D2), jnp.float32),
        grid=(B, N // TN),
        in_specs=[pl.BlockSpec((1, TN, C), lambda b, n: (b, n, 0)),
                  pl.BlockSpec((1, C, S), lambda b, n: (b, 0, 0)),
                  pl.BlockSpec((1, S, D2), lambda b, n: (b, 0, 0))],
        out_specs=pl.BlockSpec((1, TN, D2), lambda b, n: (b, n, 0)),
        compiler_params=pltpu.CompilerParams(
            dimension_semantics=("parallel", "parallel"),
            vmem_limit_bytes=_VMEM_LIMIT),
    )(xyz1t, xyz2_cs, p2t)


def _bn_relu(y, ssum, ssq, gamma, beta, count, tile):
    M, Cout = y.shape
    return pl.pallas_call(
        functools.partial(_bn_relu_kernel, count=float(count)),
        out_shape=jax.ShapeDtypeStruct((M, Cout), jnp.float32),
        grid=(M // tile,),
        in_specs=[pl.BlockSpec((tile, Cout), lambda m: (m, 0)),
                  pl.BlockSpec((1, Cout), lambda m: (0, 0)),
                  pl.BlockSpec((1, Cout), lambda m: (0, 0)),
                  pl.BlockSpec((1, Cout), lambda m: (0, 0)),
                  pl.BlockSpec((1, Cout), lambda m: (0, 0))],
        out_specs=pl.BlockSpec((tile, Cout), lambda m: (m, 0)),
        compiler_params=pltpu.CompilerParams(
            dimension_semantics=("parallel",),
            vmem_limit_bytes=_VMEM_LIMIT),
    )(y, ssum, ssq, gamma, beta)


def mlp_layer(x, w_bf16, b, gamma, beta):
    """One 1x1-conv + BatchNorm(train) + ReLU layer, tiled over M with two passes."""
    M, Cin = x.shape
    Cout = w_bf16.shape[1]
    TM = _pick_tile(M, 512)
    y, ssum, ssq = pl.pallas_call(
        _layer_stats_kernel,
        out_shape=(jax.ShapeDtypeStruct((M, Cout), jnp.float32),
                   jax.ShapeDtypeStruct((1, Cout), jnp.float32),
                   jax.ShapeDtypeStruct((1, Cout), jnp.float32)),
        grid=(M // TM,),
        in_specs=[pl.BlockSpec((TM, Cin), lambda m: (m, 0)),
                  pl.BlockSpec((Cin, Cout), lambda m: (0, 0)),
                  pl.BlockSpec((1, Cout), lambda m: (0, 0))],
        out_specs=(pl.BlockSpec((TM, Cout), lambda m: (m, 0)),
                   pl.BlockSpec((1, Cout), lambda m: (0, 0)),
                   pl.BlockSpec((1, Cout), lambda m: (0, 0))),
        compiler_params=pltpu.CompilerParams(
            dimension_semantics=("arbitrary",),          # stats accumulate across tiles
            vmem_limit_bytes=_VMEM_LIMIT),
    )(x, w_bf16, b)
    return _bn_relu(y, ssum, ssq, gamma, beta, count=M, tile=TM)


def _fused_first_layer(xyz1t, xyz2_cs, p2t, p1t, w0_bf16, b0, g0, be0):
    """Interp + (split-weight) conv1 + BN-stat pass, then BN/ReLU pass. Returns [M, Cout]."""
    B, N, C = xyz1t.shape
    S = xyz2_cs.shape[2]
    D2 = p2t.shape[2]
    D1 = p1t.shape[2]
    Cout = w0_bf16.shape[1]
    TN = _pick_tile(N, 256)
    s_bits = max(1, (S - 1).bit_length())
    w1 = w0_bf16[:D1]          # conv weight split: points1 part
    w2 = w0_bf16[D1:]          # interpolated-features part
    y, ssum, ssq = pl.pallas_call(
        functools.partial(_fused_layer1_kernel, s_bits=s_bits),
        out_shape=(jax.ShapeDtypeStruct((B, N, Cout), jnp.float32),
                   jax.ShapeDtypeStruct((1, Cout), jnp.float32),
                   jax.ShapeDtypeStruct((1, Cout), jnp.float32)),
        grid=(B, N // TN),
        in_specs=[pl.BlockSpec((1, TN, C), lambda b, n: (b, n, 0)),
                  pl.BlockSpec((1, C, S), lambda b, n: (b, 0, 0)),
                  pl.BlockSpec((1, S, D2), lambda b, n: (b, 0, 0)),
                  pl.BlockSpec((1, TN, D1), lambda b, n: (b, n, 0)),
                  pl.BlockSpec((D1, Cout), lambda b, n: (0, 0)),
                  pl.BlockSpec((D2, Cout), lambda b, n: (0, 0)),
                  pl.BlockSpec((1, Cout), lambda b, n: (0, 0))],
        out_specs=(pl.BlockSpec((1, TN, Cout), lambda b, n: (b, n, 0)),
                   pl.BlockSpec((1, Cout), lambda b, n: (0, 0)),
                   pl.BlockSpec((1, Cout), lambda b, n: (0, 0))),
        compiler_params=pltpu.CompilerParams(
            dimension_semantics=("arbitrary", "arbitrary"),   # stats accumulate over whole grid
            vmem_limit_bytes=_VMEM_LIMIT),
    )(xyz1t, xyz2_cs, p2t, p1t, w1, w2, b0)
    M = B * N
    return _bn_relu(y.reshape(M, Cout), ssum, ssq, g0, be0,
                    count=M, tile=_pick_tile(M, 512))


# ---------------------------------------------------------------------------
# Public forward (PyTorch layout in / out)
# ---------------------------------------------------------------------------
def pointnet_fp_forward(xyz1, xyz2, points1, points2, params):
    """xyz1 [B,C,N], xyz2 [B,C,S], points1 [B,D1,N] or None, points2 [B,D2,S]
    -> [B, D', N]. params: list of (conv_w [Cin,Cout], conv_b, bn_gamma, bn_beta)."""
    B, C, N = xyz1.shape
    S = xyz2.shape[2]
    assert S == 1 or S >= 3, "3-NN interpolation (like the reference) requires S>=3"
    xyz1t = jnp.transpose(xyz1, (0, 2, 1))        # [B, N, C]
    p2t = jnp.transpose(points2, (0, 2, 1))       # [B, S, D2]
    M = B * N
    n_layers = len(params)
    w_bf = [w.astype(jnp.bfloat16) for (w, _, _, _) in params]   # MXU operands in bf16

    if n_layers and S > 1 and points1 is not None:
        # Main path: interpolation fused into the first MLP layer (no interp/concat HBM trip).
        p1t = jnp.transpose(points1, (0, 2, 1))   # [B, N, D1]
        _, b0, g0, be0 = params[0]
        x = _fused_first_layer(xyz1t, xyz2, p2t, p1t, w_bf[0], b0, g0, be0)
        start = 1
    else:
        if S == 1:
            interp = jnp.tile(p2t, (1, N, 1))     # broadcast branch of the reference (glue)
        else:
            interp = interpolate_points(xyz1t, xyz2, p2t)
        if points1 is not None:
            p1t = jnp.transpose(points1, (0, 2, 1))
            # TODO(synk): fallback path still materializes the concat in HBM.
            x = jnp.concatenate([p1t, interp], axis=-1)
        else:
            x = interp
        x = x.reshape(M, -1)
        if n_layers == 0:
            return jnp.transpose(x.reshape(B, N, -1), (0, 2, 1))
        start = 0

    for i in range(start, n_layers):
        _, b, g, be = params[i]
        x = mlp_layer(x, w_bf[i], b, g, be)
    return jnp.transpose(x.reshape(B, N, -1), (0, 2, 1))


def init_params(in_channel, mlp, key):
    """Deterministic synthetic parameters: conv weight [Cin,Cout], conv bias,
    BN gamma, BN beta for each MLP layer."""
    params = []
    last = in_channel
    for out_ch in mlp:
        key, k1, k2, k3, k4 = jax.random.split(key, 5)
        w = 0.1 * jax.random.normal(k1, (last, out_ch), jnp.float32)
        b = 0.1 * jax.random.normal(k2, (1, out_ch), jnp.float32)
        g = 1.0 + 0.1 * jax.random.normal(k3, (1, out_ch), jnp.float32)
        be = 0.1 * jax.random.normal(k4, (1, out_ch), jnp.float32)
        params.append((w, b, g, be))
        last = out_ch
    return params


def reference_forward(xyz1, xyz2, points1, points2, params):
    """Pure-JAX f32 reference mirroring the PyTorch module (for correctness check)."""
    xyz1t = jnp.transpose(xyz1, (0, 2, 1))
    xyz2t = jnp.transpose(xyz2, (0, 2, 1))
    p2t = jnp.transpose(points2, (0, 2, 1))
    B, N, _ = xyz1t.shape
    S = xyz2t.shape[1]
    if S == 1:
        interp = jnp.tile(p2t, (1, N, 1))
    else:
        d = (jnp.sum(xyz1t ** 2, -1)[:, :, None] + jnp.sum(xyz2t ** 2, -1)[:, None, :]
             - 2.0 * jnp.einsum('bnc,bmc->bnm', xyz1t, xyz2t))
        neg_d, idx = jax.lax.top_k(-d, 3)
        dists = -neg_d
        recip = 1.0 / (dists + 1e-8)
        wgt = recip / jnp.sum(recip, -1, keepdims=True)
        gathered = jax.vmap(lambda p, i: p[i])(p2t, idx)     # [B, N, 3, D2]
        interp = jnp.sum(gathered * wgt[..., None], axis=2)
    if points1 is not None:
        p1t = jnp.transpose(points1, (0, 2, 1))
        x = jnp.concatenate([p1t, interp], axis=-1)
    else:
        x = interp
    x = x.reshape(B * N, -1)
    for (w, b, g, be) in params:
        y = x @ w + b
        mean = jnp.mean(y, axis=0, keepdims=True)
        var = jnp.mean((y - mean) ** 2, axis=0, keepdims=True)
        x = jnp.maximum(g * (y - mean) * jax.lax.rsqrt(var + 1e-5) + be, 0.0)
    return jnp.transpose(x.reshape(B, N, -1), (0, 2, 1))


if __name__ == "__main__":
    B, C, N, S = 2, 3, 16, 8     # B batches, 3-D coords, N dense points, S sampled points
    D1, D2 = 4, 8                # points1 / points2 feature channels
    mlp = [32, 16]
    in_channel = D1 + D2

    key = jax.random.PRNGKey(0)
    k_xyz1, k_xyz2, k_p1, k_p2, k_params = jax.random.split(key, 5)
    xyz1 = jax.random.normal(k_xyz1, (B, C, N), jnp.float32)
    xyz2 = jax.random.normal(k_xyz2, (B, C, S), jnp.float32)
    points1 = jax.random.normal(k_p1, (B, D1, N), jnp.float32)
    points2 = jax.random.normal(k_p2, (B, D2, S), jnp.float32)
    params = init_params(in_channel, mlp, k_params)

    # Main (fused) path. Tolerances loosened for bf16 MXU operands (f32 accumulation).
    out = jax.block_until_ready(pointnet_fp_forward(xyz1, xyz2, points1, points2, params))
    ref = jax.block_until_ready(reference_forward(xyz1, xyz2, points1, points2, params))
    assert out.shape == (B, mlp[-1], N), out.shape
    np.testing.assert_allclose(np.asarray(out), np.asarray(ref), rtol=5e-2, atol=5e-2)

    # points1=None path (standalone interpolation kernel + generic MLP layers).
    params_np1 = init_params(D2, mlp, k_params)
    out2 = jax.block_until_ready(pointnet_fp_forward(xyz1, xyz2, None, points2, params_np1))
    ref2 = jax.block_until_ready(reference_forward(xyz1, xyz2, None, points2, params_np1))
    np.testing.assert_allclose(np.asarray(out2), np.asarray(ref2), rtol=5e-2, atol=5e-2)

    print("KERNEL_OK")
</pallas_src>

<mosaic_0001>
module attributes {stable_mosaic.version = 11 : i64} {
  func.func @_fused_layer1_kernel(%arg0: i32, %arg1: i32, %arg2: memref<1x16x3xf32, #tpu.memory_space<vmem>>, %arg3: memref<1x3x8xf32, #tpu.memory_space<vmem>>, %arg4: memref<1x8x8xf32, #tpu.memory_space<vmem>>, %arg5: memref<1x16x4xf32, #tpu.memory_space<vmem>>, %arg6: memref<4x32xbf16, #tpu.memory_space<vmem>>, %arg7: memref<8x32xbf16, #tpu.memory_space<vmem>>, %arg8: memref<1x32xf32, #tpu.memory_space<vmem>>, %arg9: memref<1x16x32xf32, #tpu.memory_space<vmem>>, %arg10: memref<1x32xf32, #tpu.memory_space<vmem>>, %arg11: memref<1x32xf32, #tpu.memory_space<vmem>>) attributes {dimension_semantics = [#tpu.dimension_semantics<arbitrary>, #tpu.dimension_semantics<arbitrary>], iteration_bounds = array<i64: 2, 1>, scalar_prefetch = 0 : i64, scratch_operands = 0 : i64, tpu.core_type = #tpu.core_type<tc>, window_params = [{transform_indices = @transform_0, window_bounds = array<i64: 1, 16, 3>}, {transform_indices = @transform_1, window_bounds = array<i64: 1, 3, 8>}, {transform_indices = @transform_2, window_bounds = array<i64: 1, 8, 8>}, {transform_indices = @transform_3, window_bounds = array<i64: 1, 16, 4>}, {pipeline_mode = #tpu.pipeline_mode<synchronous>, transform_indices = @transform_4, window_bounds = array<i64: 4, 32>}, {pipeline_mode = #tpu.pipeline_mode<synchronous>, transform_indices = @transform_5, window_bounds = array<i64: 8, 32>}, {pipeline_mode = #tpu.pipeline_mode<synchronous>, transform_indices = @transform_6, window_bounds = array<i64: 1, 32>}, {transform_indices = @transform_7, window_bounds = array<i64: 1, 16, 32>}, {pipeline_mode = #tpu.pipeline_mode<synchronous>, transform_indices = @transform_8, window_bounds = array<i64: 1, 32>}, {pipeline_mode = #tpu.pipeline_mode<synchronous>, transform_indices = @transform_9, window_bounds = array<i64: 1, 32>}]} {
    %c0 = arith.constant 0 : index
    %c0_0 = arith.constant 0 : index
    %c0_1 = arith.constant 0 : index
    %0 = vector.load %arg2[%c0, %c0_0, %c0_1] : memref<1x16x3xf32, #tpu.memory_space<vmem>>, vector<1x16x3xf32>
    %1 = vector.shape_cast %0 : vector<1x16x3xf32> to vector<16x3xf32>
    %c0_2 = arith.constant 0 : index
    %c0_3 = arith.constant 0 : index
    %c0_4 = arith.constant 0 : index
    %2 = vector.load %arg3[%c0_2, %c0_3, %c0_4] : memref<1x3x8xf32, #tpu.memory_space<vmem>>, vector<1x3x8xf32>
    %3 = vector.shape_cast %2 : vector<1x3x8xf32> to vector<3x8xf32>
    %c0_5 = arith.constant 0 : index
    %c0_6 = arith.constant 0 : index
    %c0_7 = arith.constant 0 : index
    %4 = vector.load %arg4[%c0_5, %c0_6, %c0_7] : memref<1x8x8xf32, #tpu.memory_space<vmem>>, vector<1x8x8xf32>
    %5 = vector.shape_cast %4 : vector<1x8x8xf32> to vector<8x8xf32>
    %cst = arith.constant 0.000000e+00 : f32
    %6 = vector.broadcast %cst : f32 to vector<16x8xf32>
    %7 = vector.extract_strided_slice %1 {offsets = [0, 0], sizes = [16, 1], strides = [1, 1]} : vector<16x3xf32> to vector<16x1xf32>
    %8 = vector.extract_strided_slice %3 {offsets = [0, 0], sizes = [1, 8], strides = [1, 1]} : vector<3x8xf32> to vector<1x8xf32>
    %9 = vector.broadcast %7 : vector<16x1xf32> to vector<16x8xf32>
    %10 = vector.broadcast %8 : vector<1x8xf32> to vector<16x8xf32>
    %11 = arith.subf %9, %10 : vector<16x8xf32>
    %12 = arith.mulf %11, %11 : vector<16x8xf32>
    %13 = arith.addf %6, %12 : vector<16x8xf32>
    %14 = vector.extract_strided_slice %1 {offsets = [0, 1], sizes = [16, 1], strides = [1, 1]} : vector<16x3xf32> to vector<16x1xf32>
    %15 = vector.extract_strided_slice %3 {offsets = [1, 0], sizes = [1, 8], strides = [1, 1]} : vector<3x8xf32> to vector<1x8xf32>
    %16 = vector.broadcast %14 : vector<16x1xf32> to vector<16x8xf32>
    %17 = vector.broadcast %15 : vector<1x8xf32> to vector<16x8xf32>
    %18 = arith.subf %16, %17 : vector<16x8xf32>
    %19 = arith.mulf %18, %18 : vector<16x8xf32>
    %20 = arith.addf %13, %19 : vector<16x8xf32>
    %21 = vector.extract_strided_slice %1 {offsets = [0, 2], sizes = [16, 1], strides = [1, 1]} : vector<16x3xf32> to vector<16x1xf32>
    %22 = vector.extract_strided_slice %3 {offsets = [2, 0], sizes = [1, 8], strides = [1, 1]} : vector<3x8xf32> to vector<1x8xf32>
    %23 = vector.broadcast %21 : vector<16x1xf32> to vector<16x8xf32>
    %24 = vector.broadcast %22 : vector<1x8xf32> to vector<16x8xf32>
    %25 = arith.subf %23, %24 : vector<16x8xf32>
    %26 = arith.mulf %25, %25 : vector<16x8xf32>
    %27 = arith.addf %20, %26 : vector<16x8xf32>
    %28 = tpu.iota {dimensions = array<i32: 1>} : vector<16x8xi32>
    %cst_8 = arith.constant 9.99999996E-13 : f32
    %29 = vector.broadcast %cst_8 : f32 to vector<16x8xf32>
    %30 = arith.addf %27, %29 : vector<16x8xf32>
    %31 = tpu.bitcast %30 : vector<16x8xf32> -> vector<16x8xi32>
    %c-8_i32 = arith.constant -8 : i32
    %32 = vector.broadcast %c-8_i32 : i32 to vector<16x8xi32>
    %33 = arith.andi %31, %32 : vector<16x8xi32>
    %34 = arith.ori %33, %28 : vector<16x8xi32>
    %35 = tpu.bitcast %34 : vector<16x8xi32> -> vector<16x8xf32>
    %cst_9 = arith.constant 0.000000e+00 : f32
    %36 = vector.broadcast %cst_9 : f32 to vector<16x8xf32>
    %cst_10 = arith.constant 0.000000e+00 : f32
    %37 = vector.broadcast %cst_10 : f32 to vector<16x1xf32>
    %cst_11 = arith.constant dense<0x7F800000> : vector<16xf32>
    %38 = vector.multi_reduction <minimumf>, %35, %cst_11 [1] : vector<16x8xf32> to vector<16xf32>
    %39 = vector.shape_cast %38 : vector<16xf32> to vector<16x1xf32>
    %40 = tpu.bitcast %39 : vector<16x1xf32> -> vector<16x1xi32>
    %c7_i32 = arith.constant 7 : i32
    %41 = vector.broadcast %c7_i32 : i32 to vector<16x1xi32>
    %42 = arith.andi %40, %41 : vector<16x1xi32>
    %c-8_i32_12 = arith.constant -8 : i32
    %43 = vector.broadcast %c-8_i32_12 : i32 to vector<16x1xi32>
    %44 = arith.andi %40, %43 : vector<16x1xi32>
    %45 = tpu.bitcast %44 : vector<16x1xi32> -> vector<16x1xf32>
    %46 = vector.broadcast %42 : vector<16x1xi32> to vector<16x8xi32>
    %47 = arith.cmpi eq, %28, %46 : vector<16x8xi32>
    %cst_13 = arith.constant 9.99999993E-9 : f32
    %48 = vector.broadcast %cst_13 : f32 to vector<16x1xf32>
    %49 = arith.addf %45, %48 : vector<16x1xf32>
    %cst_14 = arith.constant 1.000000e+00 : f32
    %50 = vector.broadcast %cst_14 : f32 to vector<16x1xf32>
    %51 = arith.divf %50, %49 : vector<16x1xf32>
    %cst_15 = arith.constant 0.000000e+00 : f32
    %52 = vector.shape_cast %51 : vector<16x1xf32> to vector<16x1xf32>
    %53 = vector.broadcast %52 : vector<16x1xf32> to vector<16x8xf32>
    %54 = vector.broadcast %cst_15 : f32 to vector<16x8xf32>
    %55 = arith.select %47, %53, %54 : vector<16x8xi1>, vector<16x8xf32>
    %56 = arith.addf %36, %55 : vector<16x8xf32>
    %57 = arith.addf %37, %51 : vector<16x1xf32>
    %cst_16 = arith.constant 0x7F800000 : f32
    %58 = vector.broadcast %cst_16 : f32 to vector<16x8xf32>
    %59 = arith.select %47, %58, %35 : vector<16x8xi1>, vector<16x8xf32>
    %cst_17 = arith.constant dense<0x7F800000> : vector<16xf32>
    %60 = vector.multi_reduction <minimumf>, %59, %cst_17 [1] : vector<16x8xf32> to vector<16xf32>
    %61 = vector.shape_cast %60 : vector<16xf32> to vector<16x1xf32>
    %62 = tpu.bitcast %61 : vector<16x1xf32> -> vector<16x1xi32>
    %c7_i32_18 = arith.constant 7 : i32
    %63 = vector.broadcast %c7_i32_18 : i32 to vector<16x1xi32>
    %64 = arith.andi %62, %63 : vector<16x1xi32>
    %c-8_i32_19 = arith.constant -8 : i32
    %65 = vector.broadcast %c-8_i32_19 : i32 to vector<16x1xi32>
    %66 = arith.andi %62, %65 : vector<16x1xi32>
    %67 = tpu.bitcast %66 : vector<16x1xi32> -> vector<16x1xf32>
    %68 = vector.broadcast %64 : vector<16x1xi32> to vector<16x8xi32>
    %69 = arith.cmpi eq, %28, %68 : vector<16x8xi32>
    %cst_20 = arith.constant 9.99999993E-9 : f32
    %70 = vector.broadcast %cst_20 : f32 to vector<16x1xf32>
    %71 = arith.addf %67, %70 : vector<16x1xf32>
    %cst_21 = arith.constant 1.000000e+00 : f32
    %72 = vector.broadcast %cst_21 : f32 to vector<16x1xf32>
    %73 = arith.divf %72, %71 : vector<16x1xf32>
    %cst_22 = arith.constant 0.000000e+00 : f32
    %74 = vector.shape_cast %73 : vector<16x1xf32> to vector<16x1xf32>
    %75 = vector.broadcast %74 : vector<16x1xf32> to vector<16x8xf32>
    %76 = vector.broadcast %cst_22 : f32 to vector<16x8xf32>
    %77 = arith.select %69, %75, %76 : vector<16x8xi1>, vector<16x8xf32>
    %78 = arith.addf %56, %77 : vector<16x8xf32>
    %79 = arith.addf %57, %73 : vector<16x1xf32>
    %cst_23 = arith.constant 0x7F800000 : f32
    %80 = vector.broadcast %cst_23 : f32 to vector<16x8xf32>
    %81 = arith.select %69, %80, %59 : vector<16x8xi1>, vector<16x8xf32>
    %cst_24 = arith.constant dense<0x7F800000> : vector<16xf32>
    %82 = vector.multi_reduction <minimumf>, %81, %cst_24 [1] : vector<16x8xf32> to vector<16xf32>
    %83 = vector.shape_cast %82 : vector<16xf32> to vector<16x1xf32>
    %84 = tpu.bitcast %83 : vector<16x1xf32> -> vector<16x1xi32>
    %c7_i32_25 = arith.constant 7 : i32
    %85 = vector.broadcast %c7_i32_25 : i32 to vector<16x1xi32>
    %86 = arith.andi %84, %85 : vector<16x1xi32>
    %c-8_i32_26 = arith.constant -8 : i32
    %87 = vector.broadcast %c-8_i32_26 : i32 to vector<16x1xi32>
    %88 = arith.andi %84, %87 : vector<16x1xi32>
    %89 = tpu.bitcast %88 : vector<16x1xi32> -> vector<16x1xf32>
    %90 = vector.broadcast %86 : vector<16x1xi32> to vector<16x8xi32>
    %91 = arith.cmpi eq, %28, %90 : vector<16x8xi32>
    %cst_27 = arith.constant 9.99999993E-9 : f32
    %92 = vector.broadcast %cst_27 : f32 to vector<16x1xf32>
    %93 = arith.addf %89, %92 : vector<16x1xf32>
    %cst_28 = arith.constant 1.000000e+00 : f32
    %94 = vector.broadcast %cst_28 : f32 to vector<16x1xf32>
    %95 = arith.divf %94, %93 : vector<16x1xf32>
    %cst_29 = arith.constant 0.000000e+00 : f32
    %96 = vector.shape_cast %95 : vector<16x1xf32> to vector<16x1xf32>
    %97 = vector.broadcast %96 : vector<16x1xf32> to vector<16x8xf32>
    %98 = vector.broadcast %cst_29 : f32 to vector<16x8xf32>
    %99 = arith.select %91, %97, %98 : vector<16x8xi1>, vector<16x8xf32>
    %100 = arith.addf %78, %99 : vector<16x8xf32>
    %101 = arith.addf %79, %95 : vector<16x1xf32>
    %102 = tpu.reciprocal %101 {approx = true} : vector<16x1xf32> -> vector<16x1xf32>
    %103 = vector.broadcast %102 : vector<16x1xf32> to vector<16x8xf32>
    %104 = arith.mulf %100, %103 : vector<16x8xf32>
    %105 = arith.truncf %104 : vector<16x8xf32> to vector<16x8xbf16>
    %106 = arith.truncf %5 : vector<8x8xf32> to vector<8x8xbf16>
    %cst_30 = arith.constant dense<0.000000e+00> : vector<16x8xf32>
    %107 = tpu.matmul %105, %106, %cst_30 {dimension_numbers = #tpu.dot_dimension_numbers<[1], [0], [0], [1], [0, 0, 1, 1], [], []>} : vector<16x8xbf16>, vector<8x8xbf16>, vector<16x8xf32> -> vector<16x8xf32>
    %c0_31 = arith.constant 0 : index
    %c0_32 = arith.constant 0 : index
    %c0_33 = arith.constant 0 : index
    %108 = vector.load %arg5[%c0_31, %c0_32, %c0_33] : memref<1x16x4xf32, #tpu.memory_space<vmem>>, vector<1x16x4xf32>
    %109 = vector.shape_cast %108 : vector<1x16x4xf32> to vector<16x4xf32>
    %110 = arith.truncf %109 : vector<16x4xf32> to vector<16x4xbf16>
    %c0_34 = arith.constant 0 : index
    %c0_35 = arith.constant 0 : index
    %111 = vector.load %arg6[%c0_34, %c0_35] : memref<4x32xbf16, #tpu.memory_space<vmem>>, vector<4x32xbf16>
    %cst_36 = arith.constant dense<0.000000e+00> : vector<16x32xf32>
    %112 = tpu.matmul %110, %111, %cst_36 {dimension_numbers = #tpu.dot_dimension_numbers<[1], [0], [0], [1], [0, 0, 1, 1], [], []>} : vector<16x4xbf16>, vector<4x32xbf16>, vector<16x32xf32> -> vector<16x32xf32>
    %113 = arith.truncf %107 : vector<16x8xf32> to vector<16x8xbf16>
    %c0_37 = arith.constant 0 : index
    %c0_38 = arith.constant 0 : index
    %114 = vector.load %arg7[%c0_37, %c0_38] : memref<8x32xbf16, #tpu.memory_space<vmem>>, vector<8x32xbf16>
    %cst_39 = arith.constant dense<0.000000e+00> : vector<16x32xf32>
    %115 = tpu.matmul %113, %114, %cst_39 {dimension_numbers = #tpu.dot_dimension_numbers<[1], [0], [0], [1], [0, 0, 1, 1], [], []>} : vector<16x8xbf16>, vector<8x32xbf16>, vector<16x32xf32> -> vector<16x32xf32>
    %116 = arith.addf %112, %115 : vector<16x32xf32>
    %c0_40 = arith.constant 0 : index
    %c0_41 = arith.constant 0 : index
    %117 = vector.load %arg8[%c0_40, %c0_41] : memref<1x32xf32, #tpu.memory_space<vmem>>, vector<1x32xf32>
    %118 = vector.broadcast %117 : vector<1x32xf32> to vector<16x32xf32>
    %119 = arith.addf %116, %118 : vector<16x32xf32>
    %c0_42 = arith.constant 0 : index
    %c0_43 = arith.constant 0 : index
    %c0_44 = arith.constant 0 : index
    %120 = vector.load %arg9[%c0_42, %c0_43, %c0_44] : memref<1x16x32xf32, #tpu.memory_space<vmem>>, vector<1x16x32xf32>
    %121 = vector.shape_cast %120 : vector<1x16x32xf32> to vector<16x32xf32>
    %122 = vector.shape_cast %119 : vector<16x32xf32> to vector<1x16x32xf32>
    tpu.vector_store %arg9[%c0_42, %c0_43, %c0_44], %122 {strides = array<i32>} : memref<1x16x32xf32, #tpu.memory_space<vmem>>, vector<1x16x32xf32>,
    %c0_i32 = arith.constant 0 : i32
    %123 = arith.cmpi eq, %arg0, %c0_i32 : i32
    %c0_i32_45 = arith.constant 0 : i32
    %124 = arith.cmpi eq, %arg1, %c0_i32_45 : i32
    %125 = arith.andi %123, %124 : i1
    %126 = arith.extui %125 : i1 to i32
    %c0_i32_46 = arith.constant 0 : i32
    %127 = arith.cmpi ne, %126, %c0_i32_46 : i32
    scf.if %127 {
      %cst_57 = arith.constant 0.000000e+00 : f32
      %139 = vector.broadcast %cst_57 : f32 to vector<1x32xf32>
      %c0_58 = arith.constant 0 : index
      %c0_59 = arith.constant 0 : index
      %140 = vector.load %arg10[%c0_58, %c0_59] : memref<1x32xf32, #tpu.memory_space<vmem>>, vector<1x32xf32>
      tpu.vector_store %arg10[%c0_58, %c0_59], %139 {strides = array<i32>} : memref<1x32xf32, #tpu.memory_space<vmem>>, vector<1x32xf32>,
      %cst_60 = arith.constant 0.000000e+00 : f32
      %141 = vector.broadcast %cst_60 : f32 to vector<1x32xf32>
      %c0_61 = arith.constant 0 : index
      %c0_62 = arith.constant 0 : index
      %142 = vector.load %arg11[%c0_61, %c0_62] : memref<1x32xf32, #tpu.memory_space<vmem>>, vector<1x32xf32>
      tpu.vector_store %arg11[%c0_61, %c0_62], %141 {strides = array<i32>} : memref<1x32xf32, #tpu.memory_space<vmem>>, vector<1x32xf32>,
    } else {
    }
    %c0_47 = arith.constant 0 : index
    %c0_48 = arith.constant 0 : index
    %128 = vector.load %arg10[%c0_47, %c0_48] : memref<1x32xf32, #tpu.memory_space<vmem>>, vector<1x32xf32>
    %cst_49 = arith.constant dense<0.000000e+00> : vector<32xf32>
    %129 = vector.multi_reduction <add>, %119, %cst_49 [0] : vector<16x32xf32> to vector<32xf32>
    %130 = vector.shape_cast %129 : vector<32xf32> to vector<1x32xf32>
    %131 = arith.addf %128, %130 : vector<1x32xf32>
    %c0_50 = arith.constant 0 : index
    %c0_51 = arith.constant 0 : index
    %132 = vector.load %arg10[%c0_50, %c0_51] : memref<1x32xf32, #tpu.memory_space<vmem>>, vector<1x32xf32>
    tpu.vector_store %arg10[%c0_50, %c0_51], %131 {strides = array<i32>} : memref<1x32xf32, #tpu.memory_space<vmem>>, vector<1x32xf32>,
    %c0_52 = arith.constant 0 : index
    %c0_53 = arith.constant 0 : index
    %133 = vector.load %arg11[%c0_52, %c0_53] : memref<1x32xf32, #tpu.memory_space<vmem>>, vector<1x32xf32>
    %134 = arith.mulf %119, %119 : vector<16x32xf32>
    %cst_54 = arith.constant dense<0.000000e+00> : vector<32xf32>
    %135 = vector.multi_reduction <add>, %134, %cst_54 [0] : vector<16x32xf32> to vector<32xf32>
    %136 = vector.shape_cast %135 : vector<32xf32> to vector<1x32xf32>
    %137 = arith.addf %133, %136 : vector<1x32xf32>
    %c0_55 = arith.constant 0 : index
    %c0_56 = arith.constant 0 : index
    %138 = vector.load %arg11[%c0_55, %c0_56] : memref<1x32xf32, #tpu.memory_space<vmem>>, vector<1x32xf32>
    tpu.vector_store %arg11[%c0_55, %c0_56], %137 {strides = array<i32>} : memref<1x32xf32, #tpu.memory_space<vmem>>, vector<1x32xf32>,
    return
  }
  func.func @transform_0(%arg0: i32, %arg1: i32) -> (i32, i32, i32) {
    %c0_i32 = arith.constant 0 : i32
    %c0_i32_0 = arith.constant 0 : i32
    return %arg0, %arg1, %c0_i32 : i32, i32, i32
  }
  func.func @transform_1(%arg0: i32, %arg1: i32) -> (i32, i32, i32) {
    %c0_i32 = arith.constant 0 : i32
    %c0_i32_0 = arith.constant 0 : i32
    %c0_i32_1 = arith.constant 0 : i32
    return %arg0, %c0_i32, %c0_i32_0 : i32, i32, i32
  }
  func.func @transform_2(%arg0: i32, %arg1: i32) -> (i32, i32, i32) {
    %c0_i32 = arith.constant 0 : i32
    %c0_i32_0 = arith.constant 0 : i32
    %c0_i32_1 = arith.constant 0 : i32
    return %arg0, %c0_i32, %c0_i32_0 : i32, i32, i32
  }
  func.func @transform_3(%arg0: i32, %arg1: i32) -> (i32, i32, i32) {
    %c0_i32 = arith.constant 0 : i32
    %c0_i32_0 = arith.constant 0 : i32
    return %arg0, %arg1, %c0_i32 : i32, i32, i32
  }
  func.func @transform_4(%arg0: i32, %arg1: i32) -> (i32, i32) {
    %c0_i32 = arith.constant 0 : i32
    %c0_i32_0 = arith.constant 0 : i32
    %c0_i32_1 = arith.constant 0 : i32
    return %c0_i32, %c0_i32_0 : i32, i32
  }
  func.func @transform_5(%arg0: i32, %arg1: i32) -> (i32, i32) {
    %c0_i32 = arith.constant 0 : i32
    %c0_i32_0 = arith.constant 0 : i32
    %c0_i32_1 = arith.constant 0 : i32
    return %c0_i32, %c0_i32_0 : i32, i32
  }
  func.func @transform_6(%arg0: i32, %arg1: i32) -> (i32, i32) {
    %c0_i32 = arith.constant 0 : i32
    %c0_i32_0 = arith.constant 0 : i32
    %c0_i32_1 = arith.constant 0 : i32
    return %c0_i32, %c0_i32_0 : i32, i32
  }
  func.func @transform_7(%arg0: i32, %arg1: i32) -> (i32, i32, i32) {
    %c0_i32 = arith.constant 0 : i32
    %c0_i32_0 = arith.constant 0 : i32
    return %arg0, %arg1, %c0_i32 : i32, i32, i32
  }
  func.func @transform_8(%arg0: i32, %arg1: i32) -> (i32, i32) {
    %c0_i32 = arith.constant 0 : i32
    %c0_i32_0 = arith.constant 0 : i32
    %c0_i32_1 = arith.constant 0 : i32
    return %c0_i32, %c0_i32_0 : i32, i32
  }
  func.func @transform_9(%arg0: i32, %arg1: i32) -> (i32, i32) {
    %c0_i32 = arith.constant 0 : i32
    %c0_i32_0 = arith.constant 0 : i32
    %c0_i32_1 = arith.constant 0 : i32
    return %c0_i32, %c0_i32_0 : i32, i32
  }
}

</mosaic_0001>

<bundles_post_ra>
// kernel: tpu_custom_call.1
= control target key start
LH: loop header
LB: loop body
LE: loop exit
PB: predicated region body
PF: predicated region fallthrough
CT: control target
= control target key end

     0   :  { %s1531_s0 = inlined_call_operand.vmem [shape: f32[2,16,3], index: 0, kind: input, shape index: {}]   ;;  %s1532_s1 = inlined_call_operand.vmem [shape: f32[2,3,8], index: 1, kind: input, shape index: {}]   ;;  %s1533_s2 = inlined_call_operand.vmem [shape: f32[2,8,8], index: 2, kind: input, shape index: {}]   ;;  %s1534_s3 = inlined_call_operand.vmem [shape: f32[2,16,4], index: 3, kind: input, shape index: {}]   ;;  %s1535_s4 = inlined_call_operand.vmem [shape: bf16[4,32], index: 4, kind: input, shape index: {}]   ;;  %s1536_s5 = inlined_call_operand.vmem [shape: bf16[8,32], index: 5, kind: input, shape index: {}]   ;;  %s1537_s6 = inlined_call_operand.vmem [shape: f32[1,32], index: 6, kind: input, shape index: {}]   ;;  %s1538_s7 = inlined_call_operand.hbm [shape: f32[2,16,32], index: 7, kind: output, shape index: {0}]   ;;  %s1539_s8 = inlined_call_operand.hbm [shape: f32[1,32], index: 8, kind: output, shape index: {1}]   ;;  %s1540_s9 = inlined_call_operand.hbm [shape: f32[1,32], index: 9, kind: output, shape index: {2}]  }
   0x1   :  { %1541 = sst [smem:[#allocation9_spill]] %s1531_s0 }
   0x2   :  { %1542 = sst [smem:[#allocation10_spill]] %s1532_s1 }
   0x3   :  { %1543 = sst [smem:[#allocation11_spill]] %s1533_s2 }
   0x4   :  { %15 = vsyncpa [#allocation3], 0 }
   0x5   :  { %17 = vsyncpa [#allocation3 + $0x1], 0 }
   0x6   :  { %18 = vsyncpa [#allocation5], 0  ;;  %s1288_s30 = smov 0   ;;  %s1290_s10 = smov 0  }
   0x7   :  { %s1292_s11 = smov 0   ;;  %s1294_s12 = smov 0  }
   0x8   :  { %s1296_s13 = smov 0   ;;  %s1298_s14 = smov 0  }
   0x9 LB: > { %s965_s15 = sadd.s32 4294967295, %s1228_s14   ;;  %s966_s16 = sadd.s32 4294967294, %s1228_s14   ;;  %s1228_s14 = sphi %s1298_s14, %s24_s14   ;;  %s1224_s13 = sphi %s1296_s13, %s1564_s13   ;;  %s1220_s12 = sphi %s1294_s12, %s1563_s12   ;;  %s1216_s11 = sphi %s1292_s11, %s1562_s11   ;;  %s1212_s10 = sphi %s1290_s10, %s1561_s10   ;;  %s1208_s30 = sphi %s1288_s30, %s1560_s30  }
   0xa   : > { %s36_s17 = sadd.s32 1, %s1224_s13  ;;  %s216_s18 = sadd.s32 1, %s1216_s11 }
   0xb   : > { %p38_p0 = scmp.ge.s32.totalorder %s36_s17, 2  ;;  %p226_p1 = scmp.ne.s32.totalorder %s1216_s11, %s1212_s10 }
   0xc   : > { %p1324_p2 = scmp.eq.s32.totalorder %s965_s15, 1  ;;  %p232_p3 = scmp.ne.s32.totalorder %s1212_s10, %s1208_s30 }
   0xd   : > { %s1566_s17 = smov (%p38_p0, %s36_s17), 0  ;;  %p233_p5 = scmp.eq.s32.totalorder %s966_s16, 1 }
   0xe   : > { %p1334_p4 = por %p1324_p2, %p226_p1  ;;  %s211_s21 = ssub.s32 %s1224_s13, %s1566_s17 }
   0xf   : > { %p969_p6 = scmp.ge.s32.totalorder %s1228_s14, 1  ;;  %p214_p7 = scmp.eq.s32.totalorder %s211_s21, 0 }
  0x10   : > { %p1341_p8 = por %p233_p5, %p232_p3  ;;  %p342_p9 = scmp.lt.s32.totalorder %s1228_s14, 3 }
  0x11   : > { %s1347_s23 = scalar_select %p214_p7, %s1216_s11, %s216_s18  }
  0x12   : > { %p343_p10 = pnand %p969_p6, %p342_p9 }
  0x13   : > { %p400_p11 = scmp.lt.s32.totalorder (!%p343_p10), %s1220_s12, 1  ;;  %s1547_s0 = sld [smem:[#allocation9_spill]] (!%p343_p10) }
  0x14   : > { %346 = sbr.rel (%p343_p10) target bundleno = 863 (0x35f), region = 48  ;;  %s1548_s1 = sld [smem:[#allocation10_spill]] (!%p343_p10) }
  0x15   : > { %s1559_s2 = sld [smem:[#allocation11_spill]] (!%p343_p10)  ;;  %p743_p12 = scmp.eq.s32.totalorder (!%p343_p10), %s1220_s12, 0 }
  0x16   : > { %s392_s26 = sand.u32 (!%p343_p10), 1, %s1212_s10  }
  0x17   : > { %s970_s27 = sshll.u32 (!%p343_p10), %s392_s26, 4 }
  0x18   : > { %s394_s15 = scalar_lea.vmem (!%p343_p10), [#allocation2], %s970_s27 }
  0x19   : > { %v1230_v0 = vmov 1   ;;  %v1231_v1 = vmov 0   ;;  %s1351_s24 = scalar_select %p400_p11, %s1220_s12, 1  ;;  %v1232_v2 = vmov 2   ;;  %v480_v18 = vlaneseq }
  0x1a   : > { %1070 = vset.pattern.permute.xlu1 %v1230_v0  ;;  %1069 = vset.pattern.permute.xlu0 %v1231_v1  ;;  %vm492_vm0 = vcmask 64512  }
  0x1b   : > { %1071 = vset.pattern.permute.xlu2 %v1232_v2  ;;  %s990_s25 = sshll.u32 %s1351_s24, 4  ;;  %s973_s29 = sshll.u32 %s1351_s24, 2  ;;  %v1363_v24 = vand.u32 127, %v480_v18 }
  0x1c   : > { %s407_s28 = scalar_lea.vmem %s1547_s0, %s990_s25  ;;  %s412_s18 = scalar_lea.vmem %s1548_s1, %s973_s29 }
  0x1d   : > { %v429_v3 = vld [vmem:[%s407_s28] sm:$0xff]  ;;  %v430_v4 = vld [vmem:[%s407_s28 + $0x8] sm:$0xff]  ;;  %s974_s21 = sshll.u32 %s1351_s24, 3  ;;  %s425_s16 = scalar_lea.vmem %s1534_s3, %s990_s25 }
  0x1e   : > { %451 = vperm.xlu1 %1070, %v429_v3   ;;  %435 = vperm.xlu0 %1069, %v429_v3   ;;  %v431_v5 = vld [vmem:[%s412_s18] sm:$0x7]  ;;  %s416_s28 = scalar_lea.vmem %s1559_s2, %s974_s21 }
  0x1f   : > { %466 = vperm.xlu2 %1071, %v429_v3   ;;  %v473_v6 = vperm.slane %v431_v5, 2  ;;  %v458_v8 = vperm.slane %v431_v5, 1  ;;  %v443_v9 = vperm.slane %v431_v5, 0 }
  0x26   : > { %455 = vperm.xlu1 %1070, %v430_v4   ;;  %440 = vperm.xlu0 %1069, %v430_v4  }
  0x27   : > { %470 = vperm.xlu2 %1071, %v430_v4  }
  0x2e   : > { %1072 = vset.pattern.permute.xlu0 %v1232_v2 }
  0x79   : > { %v467_v7 = vpop.permute.xlu2 %466 }
  0x7a   : > { %v474_v10 = vsub.f32 %v467_v7, %v473_v6 }
  0x7c   : > { %v476_v15 = vmul.f32 %v474_v10, %v474_v10 }
  0x81   : > { %v471_v20 = vpop.permute.xlu2 %470 }
  0x82   : > { %v475_v25 = vsub.f32 %v471_v20, %v473_v6 }
  0x84   : > { %v477_v32 = vmul.f32 %v475_v25, %v475_v25 }
  0x90   : > { %v452_v11 = vpop.permute.xlu1 %451  ;;  %v436_v12 = vpop.permute.xlu0 %435 }
  0x91   : > { %v459_v13 = vsub.f32 %v452_v11, %v458_v8  ;;  %v444_v14 = vsub.f32 %v436_v12, %v443_v9 }
  0x93   : > { %v461_v16 = vmul.f32 %v459_v13, %v459_v13  ;;  %v446_v17 = vmul.f32 %v444_v14, %v444_v14 }
  0x95   : > { %v463_v19 = vadd.f32 %v461_v16, %v446_v17 }
  0x97   : > { %v478_v21 = vadd.f32 %v476_v15, %v463_v19 }
  0x98   : > { %v456_v22 = vpop.permute.xlu1 %455  ;;  %v441_v23 = vpop.permute.xlu0 %440 }
  0x99   : > { %v460_v26 = vsub.f32 %v456_v22, %v458_v8  ;;  %v445_v27 = vsub.f32 %v441_v23, %v443_v9  ;;  %v482_v28 = vadd.f32 1e-12, %v478_v21 }
  0x9b   : > { %v462_v29 = vmul.f32 %v460_v26, %v460_v26  ;;  %v447_v30 = vmul.f32 %v445_v27, %v445_v27  ;;  %v486_v31 = vand.u32 4294967288, %v482_v28 }
  0x9d   : > { %v464_v33 = vadd.f32 %v462_v29, %v447_v30  ;;  %v488_v34 = vor.u32 %v486_v31, %v1363_v24 }
  0x9f   : > { %v479_v35 = vadd.f32 %v477_v32, %v464_v33  ;;  %v493_v36 = vsel %vm492_vm0, %v488_v34, inf }
  0xa0   : > { %494 = vmin.xlane.f32.xlu0 %v493_v36 }
  0xa1   : > { %v483_v37 = vadd.f32 1e-12, %v479_v35 }
  0xa3   : > { %v487_v38 = vand.u32 4294967288, %v483_v37 }
  0xa5   : > { %v489_v39 = vor.u32 %v487_v38, %v1363_v24 }
  0xa7   : > { %v496_v40 = vsel %vm492_vm0, %v489_v39, inf }
  0xa8   : > { %497 = vmin.xlane.f32.xlu1 %v496_v40 }
 0x113   : > { %v495_v41 = vpop.xlane.xlu0 %494 }
 0x114   : > { %v501_v42 = vand.u32 7, %v495_v41  ;;  %v503_v51 = vand.u32 4294967288, %v495_v41 }
 0x116   : > { %vm1370_vm1 = vcmp.eq.s32.totalorder %v1363_v24, %v501_v42  ;;  %v509_v52 = vadd.f32 1e-08, %v503_v51 }
 0x117   : > { %v547_v44 = vsel %vm1370_vm1, inf, %v488_v34 }
 0x118   : > { %v549_v45 = vsel %vm492_vm0, %v547_v44, inf  ;;  %1074 = vrcp.f32 %v509_v52  ;;  %vm516_vm6 = vweird.f32 %v509_v52  ;;  %v522_v14 = vand.u32 2147483648, %v509_v52 }
 0x119   : > { %550 = vmin.xlane.f32.xlu2 %v549_v45  ;;  %v520_v16 = vand.u32 2147483647, %v509_v52 }
 0x11a   : > { %v523_v25 = vor.u32 1.1754944e-38, %v522_v14 }
 0x11b   : > { %v498_v46 = vpop.xlane.xlu1 %497  ;;  %vm521_vm9 = vcmp.eq.f32.partialorder %v520_v16, 8.507059e+37 }
 0x11c   : > { %v502_v47 = vand.u32 7, %v498_v46  ;;  %v504_v53 = vand.u32 4294967288, %v498_v46 }
 0x11e   : > { %vm1378_vm2 = vcmp.eq.s32.totalorder %v1363_v24, %v502_v47  ;;  %v1385_v54 = vadd.f32 1e-08, %v504_v53  ;;  %v1075_v55 = vpop.eup %1074 }
 0x11f   : > { %v548_v49 = vsel %vm1378_vm2, inf, %v489_v39  ;;  %v512_v56 = vmul.f32 %v1075_v55, %v509_v52  ;;  %vm517_vm4 = vweird.f32 %v1075_v55 }
 0x120   : > { %v552_v50 = vsel %vm492_vm0, %v548_v49, inf  ;;  %1076 = vrcp.f32 %v1385_v54  ;;  %vm1407_vm7 = vmor %vm516_vm6, %vm517_vm4  ;;  %vm531_vm14 = vweird.f32 %v1385_v54  ;;  %v537_v33 = vand.u32 2147483648, %v1385_v54 }
 0x121   : > { %553 = vmin.xlane.f32.xlu2 %v552_v50  ;;  %v513_v60 = vsub.f32 1.0, %v512_v56  ;;  %v535_v36 = vand.u32 2147483647, %v1385_v54 }
 0x122   : > { %v538_v45 = vor.u32 1.1754944e-38, %v537_v33 }
 0x123   : > { %v514_v2 = vmul.f32 %v1075_v55, %v513_v60  ;;  %vm536_vm6 = vcmp.eq.f32.partialorder %v535_v36, 8.507059e+37 }
 0x125   : > { %v515_v8 = vadd.f32 %v1075_v55, %v514_v2 }
 0x126   : > { %v1395_v0 = vpop.eup %1076 }
 0x127   : > { %v527_v3 = vmul.f32 %v1395_v0, %v1385_v54  ;;  %v519_v19 = vsel %vm1407_vm7, %v1075_v55, %v515_v8  ;;  %vm532_vm11 = vweird.f32 %v1395_v0  ;;  %v432_v55 = vld [vmem:[%s416_s28] sm:$0xff] }
 0x128   : > { %v1415_v28 = vsel %vm521_vm9, %v523_v25, %v519_v19  ;;  %vm533_vm15 = vmor %vm531_vm14, %vm532_vm11 }
 0x129   : > { %v528_v11 = vsub.f32 1.0, %v527_v3  ;;  %v541_v35 = vsel %vm1370_vm1, %v1415_v28, 0.0  ;;  %v687_v3 = vld [vmem:[%s425_s16 + $0x8] sm:$0xff] }
 0x12b   : > { %v529_v21 = vmul.f32 %v1395_v0, %v528_v11 }
 0x12d   : > { %v530_v30 = vadd.f32 %v1395_v0, %v529_v21 }
 0x12f   : > { %v534_v41 = vsel %vm533_vm15, %v1395_v0, %v530_v30  ;;  %v686_v0 = vld [vmem:[%s425_s16] sm:$0xff] }
 0x130   : > { %v1430_v46 = vsel %vm536_vm6, %v538_v45, %v534_v41  ;;  %v1073_v45 = vld [vmem:[%s1537_s6] ss:$0 sm:$0xff] }
 0x131   : > { %v542_v51 = vsel %vm1378_vm2, %v1430_v46, 0.0  ;;  %vm716_vm2 = vcmask 1041408  }
 0x18c   : > { %v551_v57 = vpop.xlane.xlu2 %550 }
 0x18d   : > { %v557_v58 = vand.u32 7, %v551_v57  ;;  %v559_v59 = vand.u32 4294967288, %v551_v57  ;;  %v664_v57 = vpack.c.bf16 %v432_v55, %v432_v55 }
 0x18f   : > { %v565_v61 = vadd.f32 1e-08, %v559_v59  ;;  %vm1389_vm3 = vcmp.eq.s32.totalorder %v1363_v24, %v557_v58 }
 0x190   : > { %v603_v63 = vsel %vm1389_vm3, inf, %v547_v44 }
 0x191   : > { %1078 = vrcp.f32 %v565_v61  ;;  %v605_v1 = vsel %vm492_vm0, %v603_v63, inf  ;;  %v578_v20 = vand.u32 2147483648, %v565_v61  ;;  %v576_v23 = vand.u32 2147483647, %v565_v61  ;;  %v689_v63 = vld [vmem:[%s1535_s4] sm:$0x3] }
 0x192   : > { %606 = vmin.xlane.f32.xlu0 %v605_v1  ;;  %vm572_vm10 = vweird.f32 %v565_v61  ;;  %v718_v2 = vsel %vm716_vm2, %v689_v63, 0 }
 0x193   : > { %v579_v29 = vor.u32 1.1754944e-38, %v578_v20  ;;  %vm577_vm13 = vcmp.eq.f32.partialorder %v576_v23, 8.507059e+37  ;;  %727 = vmatpush.bf16.msra.mxu2 %v718_v2 }
 0x194   : > { %v554_v4 = vpop.xlane.xlu2 %553 }
 0x195   : > { %v558_v5 = vand.u32 7, %v554_v4  ;;  %v560_v6 = vand.u32 4294967288, %v554_v4 }
 0x197   : > { %v1079_v7 = vpop.eup %1078  ;;  %v566_v9 = vadd.f32 1e-08, %v560_v6  ;;  %vm1401_vm5 = vcmp.eq.s32.totalorder %v1363_v24, %v558_v5  ;;  %v688_v5 = vpack.c.bf16 %v687_v3, %v686_v0 }
 0x198   : > { %v568_v12 = vmul.f32 %v1079_v7, %v565_v61  ;;  %v604_v13 = vsel %vm1401_vm5, inf, %v548_v49  ;;  %vm573_vm8 = vweird.f32 %v1079_v7 }
 0x199   : > { %1080 = vrcp.f32 %v566_v9  ;;  %v608_v18 = vsel %vm492_vm0, %v604_v13, inf  ;;  %vm574_vm12 = vmor %vm572_vm10, %vm573_vm8  ;;  %v593_v40 = vand.u32 2147483648, %v566_v9  ;;  %v591_v44 = vand.u32 2147483647, %v566_v9 }
 0x19a   : > { %v569_v17 = vsub.f32 1.0, %v568_v12  ;;  %609 = vmin.xlane.f32.xlu1 %v608_v18  ;;  %vm587_vm1 = vweird.f32 %v566_v9  ;;  %vm668_vm8 = vcmask 1043456  }
 0x19b   : > { %v594_v47 = vor.u32 1.1754944e-38, %v593_v40  ;;  %v670_v59 = vsel %vm668_vm8, %v664_v57, 0 }
 0x19c   : > { %v570_v22 = vmul.f32 %v1079_v7, %v569_v17  ;;  %679 = vmatpush.bf16.msra.mxu0 %v670_v59 }
 0x19e   : > { %v571_v26 = vadd.f32 %v1079_v7, %v570_v22 }
 0x19f   : > { %v1081_v27 = vpop.eup %1080 }
 0x1a0   : > { %v575_v31 = vsel %vm574_vm12, %v1079_v7, %v571_v26  ;;  %v583_v32 = vmul.f32 %v1081_v27, %v566_v9  ;;  %vm588_vm4 = vweird.f32 %v1081_v27 }
 0x1a1   : > { %v580_v34 = vsel %vm577_vm13, %v579_v29, %v575_v31  ;;  %vm589_vm7 = vmor %vm587_vm1, %vm588_vm4 }
 0x1a2   : > { %v597_v37 = vsel %vm1389_vm3, %v580_v34, 0.0  ;;  %v584_v38 = vsub.f32 1.0, %v583_v32  ;;  %vm592_vm3 = vcmp.eq.f32.partialorder %v591_v44, 8.507059e+37  ;;  %v601_v12 = vadd.f32 %v580_v34, %v1415_v28 }
 0x1a3   : > { %v1427_v39 = vadd.f32 %v597_v37, %v541_v35 }
 0x1a4   : > { %v585_v42 = vmul.f32 %v1081_v27, %v584_v38 }
 0x1a6   : > { %v586_v43 = vadd.f32 %v1081_v27, %v585_v42 }
 0x1a8   : > { %v590_v49 = vsel %vm589_vm7, %v1081_v27, %v586_v43  ;;  %vm740_vm7 = vcmask 261120  }
 0x1a9   : > { %v595_v50 = vsel %vm592_vm3, %v594_v47, %v590_v49 }
 0x1aa   : > { %v598_v52 = vsel %vm1401_vm5, %v595_v50, 0.0  ;;  %vm712_vm5 = vcmask 31744   ;;  %v602_v26 = vadd.f32 %v595_v50, %v1430_v46 }
 0x1ab   : > { %v1437_v53 = vadd.f32 %v598_v52, %v542_v51  ;;  %979 = vmatmul.msk.bf16.vlgmr.msra.gmra.mxu2 %vm712_vm5, %v688_v5 }
 0x205   : > { %v607_v54 = vpop.xlane.xlu0 %606 }
 0x206   : > { %v615_v56 = vand.u32 4294967288, %v607_v54  ;;  %v613_v15 = vand.u32 7, %v607_v54 }
 0x208   : > { %v621_v58 = vadd.f32 1e-08, %v615_v56  ;;  %vm619_vm14 = vcmp.eq.s32.totalorder %v1363_v24, %v613_v15 }
 0x20a   : > { %1082 = vrcp.f32 %v621_v58  ;;  %v634_v6 = vand.u32 2147483648, %v621_v58  ;;  %v632_v8 = vand.u32 2147483647, %v621_v58  ;;  %vm628_vm10 = vweird.f32 %v621_v58 }
 0x20c   : > { %v635_v11 = vor.u32 1.1754944e-38, %v634_v6  ;;  %vm633_vm12 = vcmp.eq.f32.partialorder %v632_v8, 8.507059e+37 }
 0x20d   : > { %v610_v48 = vpop.xlane.xlu1 %609 }
 0x20e   : > { %v616_v60 = vand.u32 4294967288, %v610_v48  ;;  %v614_v29 = vand.u32 7, %v610_v48 }
 0x210   : > { %v1083_v61 = vpop.eup %1082  ;;  %v622_v62 = vadd.f32 1e-08, %v616_v60  ;;  %vm620_vm1 = vcmp.eq.s32.totalorder %v1363_v24, %v614_v29 }
 0x211   : > { %v624_v1 = vmul.f32 %v1083_v61, %v621_v58  ;;  %vm629_vm9 = vweird.f32 %v1083_v61 }
 0x212   : > { %1084 = vrcp.f32 %v622_v62  ;;  %vm630_vm11 = vmor %vm628_vm10, %vm629_vm9  ;;  %v649_v19 = vand.u32 2147483648, %v622_v62  ;;  %v647_v21 = vand.u32 2147483647, %v622_v62  ;;  %vm643_vm15 = vweird.f32 %v622_v62 }
 0x213   : > { %v625_v4 = vsub.f32 1.0, %v624_v1 }
 0x214   : > { %v650_v25 = vor.u32 1.1754944e-38, %v649_v19  ;;  %vm648_vm6 = vcmp.eq.f32.partialorder %v647_v21, 8.507059e+37 }
 0x215   : > { %v626_v7 = vmul.f32 %v1083_v61, %v625_v4 }
 0x217   : > { %v627_v9 = vadd.f32 %v1083_v61, %v626_v7 }
 0x218   : > { %v1085_v10 = vpop.eup %1084 }
 0x219   : > { %v631_v13 = vsel %vm630_vm11, %v1083_v61, %v627_v9  ;;  %v639_v14 = vmul.f32 %v1085_v10, %v622_v62  ;;  %vm644_vm13 = vweird.f32 %v1085_v10 }
 0x21a   : > { %v636_v16 = vsel %vm633_vm12, %v635_v11, %v631_v13  ;;  %vm645_vm4 = vmor %vm643_vm15, %vm644_vm13 }
 0x21b   : > { %v657_v17 = vadd.f32 %v636_v16, %v601_v12  ;;  %v640_v18 = vsub.f32 1.0, %v639_v14  ;;  %v653_v22 = vsel %vm619_vm14, %v636_v16, 0.0 }
 0x21c   : > { %v655_v28 = vadd.f32 %v653_v22, %v1427_v39  ;;  %v691_v39 = vld [vmem:[%s1536_s5] sm:$0xf] }
 0x21d   : > { %1086 = vrcp.f32 %v657_v17  ;;  %v641_v20 = vmul.f32 %v1085_v10, %v640_v18  ;;  %v696_v40 = vsel %vm668_vm8, %v691_v39, 0 }
 0x21e   : > { %705 = vmatpush.bf16.msra.mxu1 %v696_v40 }
 0x21f   : > { %v642_v23 = vadd.f32 %v1085_v10, %v641_v20 }
 0x221   : > { %v646_v27 = vsel %vm645_vm4, %v1085_v10, %v642_v23 }
 0x222   : > { %v651_v30 = vsel %vm648_vm6, %v650_v25, %v646_v27 }
 0x223   : > { %v1087_v31 = vpop.eup %1086  ;;  %v658_v32 = vadd.f32 %v651_v30, %v602_v26  ;;  %v654_v34 = vsel %vm620_vm1, %v651_v30, 0.0 }
 0x224   : > { %v661_v33 = vmul.f32 %v1087_v31, %v655_v28  ;;  %v656_v35 = vadd.f32 %v654_v34, %v1437_v53  ;;  %v1233_v53 = vmov (%p743_p12), 0.0  }
 0x225   : > { %1088 = vrcp.f32 %v658_v32 }
 0x22b   : > { %v1089_v36 = vpop.eup %1088 }
 0x22c   : > { %v662_v37 = vmul.f32 %v1089_v36, %v656_v35 }
 0x22e   : > { %v663_v38 = vpack.c.bf16 %v662_v37, %v661_v33  ;;  %v729_v24 = vpop.f32.mrf.mxu2 }
 0x230   : > { %977 = vmatmul.msk.bf16.vlgmr.msra.gmra.mxu0 %vm492_vm0, %v663_v38 }
 0x236   : > { %v731_v49 = vpop.f32.mrf.mxu2 }
 0x2ad   : > { %v681_v41 = vpop.f32.mrf.mxu0 }
 0x2b5   : > { %v683_v42 = vpop.f32.mrf.mxu0 }
 0x2b6   : > { %v690_v44 = vpack.c.bf16 %v683_v42, %v681_v41 }
 0x2b8   : > { %978 = vmatmul.msk.bf16.vlgmr.msra.gmra.mxu1 %vm492_vm0, %v690_v44  ;;  %vm749_vm0 = vcmask (%p743_p12), 253952  }
 0x2b9   : > { %750 = vst.msk [vmem:[#allocation4] sm:$0x1] (%p743_p12), %vm749_vm0, %v1233_v53 }
 0x2ba   : > { %751 = vst.msk [vmem:[#allocation6] sm:$0x1] (%p743_p12), %vm749_vm0, %v1233_v53 }
 0x335   : > { %v707_v43 = vpop.f32.mrf.mxu1 }
 0x336   : > { %v730_v46 = vadd.f32 %v729_v24, %v707_v43 }
 0x338   : > { %v738_v47 = vadd.f32 %v1073_v45, %v730_v46 }
 0x33a   : > { %741 = vst.msk [vmem:[%s394_s15] sm:$0xff] %vm740_vm7, %v738_v47 }
 0x33d   : > { %v709_v50 = vpop.f32.mrf.mxu1 }
 0x33e   : > { %v732_v51 = vadd.f32 %v731_v49, %v709_v50  ;;  %748 = sbr.rel (!%p743_p12) target bundleno = 835 (0x343), region = 52 }
 0x340   : > { %v739_v52 = vadd.f32 %v1073_v45, %v732_v51 }
 0x342   : > { %742 = vst.msk [vmem:[%s394_s15 + $0x8] sm:$0xff] %vm740_vm7, %v739_v52 }
 0x343 PF: > { %v753_v54 = vsel %vm740_vm7, %v738_v47, 0.0  ;;  %v754_v55 = vsel %vm740_vm7, %v739_v52, 0.0  ;;  %v766_v56 = vmul.f32 %v738_v47, %v738_v47  ;;  %v767_v58 = vmul.f32 %v739_v52, %v739_v52  ;;  %s993_s16 = sshll.u32 %s1220_s12, 4  ;;  %s794_s18 = sshll.u32 %s394_s15, 4  ;;  %s795_s18 = int_to_ptr.vmem [resolvable:$true] %s794_s18 }
 0x344   : > { %v755_v57 = vadd.f32 %v754_v55, %v753_v54  ;;  %s793_s25 = scalar_lea.hbm %s1538_s7, %s993_s16  ;;  %s780_s28 = scalar_lea.sflag [#allocation3], %s392_s26 }
 0x345   : > { %v768_v59 = vsel %vm740_vm7, %v766_v56, 0.0  ;;  %v769_v60 = vsel %vm740_vm7, %v767_v58, 0.0  ;;  %s796_s27 = sshll.u32 %s793_s25, 4  ;;  %s1110_s21 = scalar_lea.hbm %s1538_s7, 32  ;;  %s797_s27 = int_to_ptr.hbm [resolvable:$true] %s796_s27 }
 0x346   : > { %v756_v48 = vrot.slane %v755_v57, 4  ;;  %v770_v61 = vadd.f32 %v769_v60, %v768_v59  ;;  %s1104_s29 = sshra.s32 %s797_s27, 4  ;;  %s1105_s29 = int_to_ptr.hbm [resolvable:$true] %s1104_s29 }
 0x347   : > { %s1106_s0 = scalar_lea.hbm %s1105_s29, 16  ;;  %p1111_p3 = scmp.lt.s32.totalorder %s1105_s29, %s1538_s7 }
 0x348   : > { %v757_v62 = vadd.f32 %v756_v48, %v755_v57  ;;  %v771_v63 = vrot.slane %v770_v61, 4  ;;  %p1107_p13 = scmp.ne.s32.totalorder %s1105_s29, %s1106_s0  ;;  %p1112_p5 = scmp.lt.s32.totalorder %s1110_s21, %s1106_s0 }
 0x34a   : > { %v758_v0 = vrot.slane %v757_v62, 2  ;;  %v772_v1 = vadd.f32 %v771_v63, %v770_v61  ;;  %p1108_p0 = pnand %p1107_p13, %p1334_p4  ;;  %p1113_p6 = por %p1112_p5, %p1111_p3 }
 0x34c   : > { %p1109_p1 = pneg %p1108_p0 }
 0x34e   : > { %p1114_p7 = pnand %p1113_p6, %p1109_p1 }
 0x350   : > { %1117 = shalt.err (!%p1114_p7)
}
 0x351   : > { %s1234_s26 = smov 128   ;;  %s1235_s25 = smov 8   ;;  %v759_v2 = vadd.f32 %v758_v0, %v757_v62  ;;  %v773_v3 = vrot.slane %v772_v1, 2  ;;  %v752_v5 = vld [vmem:[#allocation4] sm:$0x1]  ;;  %vm763_vm3 = vcmask 253952  }
 0x352   : > { %994 = dma.vmem_to_hbm [thread:$0]  (%p1334_p4), %s795_s18, 256, %s797_s27, %s780_s28, %s1234_s26, %s1234_s26, %s1235_s25   ;;  %v765_v10 = vld [vmem:[#allocation6] sm:$0x1] }
 0x353   : > { %v760_v4 = vrot.slane %v759_v2, 1  ;;  %v774_v6 = vadd.f32 %v773_v3, %v772_v1  ;;  %s1236_s12 = smov [#allocation4]   ;;  %s811_s29 = sshll.u32 %s1539_s8, 4  ;;  %s812_s29 = int_to_ptr.hbm [resolvable:$true] %s811_s29 }
 0x354   : > { %s809_s15 = sshll.u32 %s1236_s12, 4  ;;  %s1237_s0 = smov [#allocation6]   ;;  %s810_s15 = int_to_ptr.vmem [resolvable:$true] %s809_s15 }
 0x355   : > { %v761_v7 = vadd.f32 %v760_v4, %v759_v2  ;;  %v775_v8 = vrot.slane %v774_v6, 1  ;;  %s821_s20 = sshll.u32 %s1237_s0, 4  ;;  %s823_s28 = sshll.u32 %s1540_s9, 4  ;;  %s822_s20 = int_to_ptr.vmem [resolvable:$true] %s821_s20  ;;  %s824_s28 = int_to_ptr.hbm [resolvable:$true] %s823_s28 }
 0x357   : > { %v762_v9 = vadd.f32 %v761_v7, %v752_v5  ;;  %v776_v11 = vadd.f32 %v775_v8, %v774_v6 }
 0x359   : > { %764 = vst.msk [vmem:[#allocation4] sm:$0x1] %vm763_vm3, %v762_v9  ;;  %v777_v12 = vadd.f32 %v776_v11, %v765_v10 }
 0x35a   : > { %996 = dma.vmem_to_hbm [thread:$0]  (%p1324_p2), %s810_s15, 16, %s812_s29, [#allocation5]  }
 0x35b   : > { %778 = vst.msk [vmem:[#allocation6] sm:$0x1] %vm763_vm3, %v777_v12 }
 0x35c   : > { %998 = dma.vmem_to_hbm [thread:$0]  (%p1324_p2), %s822_s20, 16, %s824_s28, [#allocation5]  }
 0x35d   : > { %1199 = dma.done.wait (%p1324_p2), [#allocation5], 32  }
 0x35e   : > { %1201 = vsyncadd (%p1324_p2), [#allocation5], 4294967264 }
 0x35f PF: > { %p1012_p4 = scmp.ge.s32.totalorder %s1228_s14, 2  ;;  %s845_s1 = sand.u32 1, %s1208_s30  }
 0x360   : > { %s846_s2 = scalar_lea.sflag [#allocation3], %s845_s1 }
 0x361   : > { %p1005_p9 = pnand %p1012_p4, %p1341_p8 }
 0x363   : > { %p1006_p10 = pneg %p1005_p9 }
 0x365   : > { %1203 = dma.done.wait (%p1006_p10), %s846_s2, 256  }
 0x366   : > { %1205 = vsyncadd (%p1006_p10), %s846_s2, 4294967040  ;;  %s24_s14 = sadd.s32 1, %s1228_s14   ;;  %s1560_s30 = smov %s1212_s10 }
 0x367   : > { %p21_p11 = scmp.ge.s32.totalorder %s24_s14, 4   ;;  %s1561_s10 = smov %s1216_s11 }
 0x368   : > { %s1562_s11 = smov %s1347_s23  ;;  %s1563_s12 = smov %s1224_s13 }
 0x369   : > { %s1564_s13 = smov %s1566_s17  ;;  %23 = sbr.rel (!%p21_p11) target bundleno = 9 (0x9), region = 112 }
 0x36e   :  { %852 = vsyncpa [#allocation3], 1 }
 0x36f   :  { %854 = vsyncpa [#allocation3 + $0x1], 1 }
 0x370   :  { %855 = vsyncpa [#allocation5], 1 }

</bundles_post_ra>
